<compile_context>
chip_gen: v6e
topology: v6e:2x2x1
jax: 0.10.0
libtpu: 0.0.40
codegen_flags: <defaults>
</compile_context>

<pallas_src>
import functools
import math

import jax
import jax.numpy as jnp
from jax import lax
from jax.experimental import pallas as pl
from jax.experimental.pallas import tpu as pltpu


_MIB = 1024 * 1024
_STREAM_TILE_BYTES = 2 * _MIB     # f32 bytes per streamed row tile (plateau zone)
_FUSED_CHUNK_BYTES = 2 * _MIB     # DMA chunk granularity in the fused path
_STREAM_VMEM_LIMIT = 48 * _MIB    # explicit limit (v5e scoped default is 16 MiB)


def _round_up(x, m):
    return ((x + m - 1) // m) * m


def _vmem_capacity_bytes():
    """Physical VMEM per TensorCore; conservative fallback if unknown."""
    try:
        cap = getattr(pltpu.get_tpu_info(), "vmem_capacity_bytes", None)
        if cap:
            return int(cap)
    except Exception:
        pass
    return 64 * _MIB              # v7x per-core value == safe lower bound


def _num_tensorcores():
    """How many TensorCores a 'parallel' grid axis can be split across."""
    try:
        kind = jax.devices()[0].device_kind.lower()
    except Exception:
        return 1
    # v5e / v6e expose a single TensorCore per device; v4/v5p (megacore) and
    # v7x can split a "parallel" grid dimension across two cores.
    single = ("v5e", "v5 lite", "v5lite", "v6e", "v6 lite", "v6lite")
    if any(tag in kind for tag in single):
        return 1
    return 2


# --------------------------------------------------------------------------
# Two-pass streaming path (arrays too large to keep resident in VMEM)
# --------------------------------------------------------------------------
def _stats_kernel(x_ref, sum_ref, sq_ref, *, n_valid_rows, row_tile,
                  tiles_base, tiles_rem):
    """Per-shard per-lane sum / sum-of-squares partials (hot loop unmasked)."""
    shard = pl.program_id(0)
    step = pl.program_id(1)

    @pl.when(step == 0)
    def _():
        sum_ref[...] = jnp.zeros_like(sum_ref)
        sq_ref[...] = jnp.zeros_like(sq_ref)

    # Remainder tiles go to the first `tiles_rem` shards.  Steps past a
    # shard's count re-map to its last tile (same block index -> no re-DMA)
    # and are skipped below.
    count = tiles_base + jnp.where(shard < tiles_rem, 1, 0)
    start = shard * tiles_base + jnp.minimum(shard, tiles_rem)
    row0 = (start + step) * row_tile
    active = step < count
    full = row0 + row_tile <= n_valid_rows

    rt, lanes = x_ref.shape

    def _accumulate(xb):
        x3 = xb.reshape(rt // 8, 8, lanes)
        sum_ref[...] += jnp.sum(x3, axis=0)
        sq_ref[...] += jnp.sum(x3 * x3, axis=0)

    @pl.when(jnp.logical_and(active, full))
    def _():
        # Fast path: interior tiles, no masking work at all.
        _accumulate(x_ref[...].astype(jnp.float32))

    @pl.when(jnp.logical_and(active, jnp.logical_not(full)))
    def _():
        # Slow path: only the single partial tail tile; sublane-only iota.
        rows = row0 + lax.broadcasted_iota(jnp.int32, (rt, 1), 0)
        xb = x_ref[...].astype(jnp.float32)
        _accumulate(jnp.where(rows < n_valid_rows, xb, 0.0))


def _normalize_kernel(x_ref, scale_ref, shift_ref, o_ref):
    """y = x * scale + shift for one row tile (scale/shift precomputed)."""
    xb = x_ref[...].astype(jnp.float32)
    o_ref[...] = (xb * scale_ref[...] + shift_ref[...]).astype(o_ref.dtype)


def _two_pass_forward(xf, gamma, beta, *, eps, n_samples, fold, C, out_dtype,
                      row_tile=None):
    n_rows, lanes = xf.shape

    if row_tile is None:
        row_tile = _STREAM_TILE_BYTES // (lanes * 4)
    row_tile = max(8, (row_tile // 8) * 8)
    row_tile = min(row_tile, _round_up(n_rows, 8))
    n_tiles = pl.cdiv(n_rows, row_tile)

    num_shards = max(1, min(_num_tensorcores(), n_tiles))
    tiles_base = n_tiles // num_shards
    tiles_rem = n_tiles % num_shards
    steps = tiles_base + (1 if tiles_rem else 0)

    def x_stats_map(s, i):
        count = tiles_base + jnp.where(s < tiles_rem, 1, 0)
        start = s * tiles_base + jnp.minimum(s, tiles_rem)
        return (start + jnp.minimum(i, count - 1), 0)

    stats_kernel = functools.partial(
        _stats_kernel, n_valid_rows=n_rows, row_tile=row_tile,
        tiles_base=tiles_base, tiles_rem=tiles_rem)

    psum, psq = pl.pallas_call(
        stats_kernel,
        out_shape=(jax.ShapeDtypeStruct((num_shards, 8, lanes), jnp.float32),
                   jax.ShapeDtypeStruct((num_shards, 8, lanes), jnp.float32)),
        grid_spec=pltpu.PrefetchScalarGridSpec(
            num_scalar_prefetch=0,
            grid=(num_shards, steps),
            in_specs=[pl.BlockSpec((row_tile, lanes), x_stats_map)],
            out_specs=(pl.BlockSpec((None, 8, lanes), lambda s, i: (s, 0, 0)),
                       pl.BlockSpec((None, 8, lanes), lambda s, i: (s, 0, 0)))),
        compiler_params=pltpu.CompilerParams(
            dimension_semantics=("parallel", "arbitrary"),
            vmem_limit_bytes=_STREAM_VMEM_LIMIT),
        cost_estimate=pl.CostEstimate(
            flops=4 * n_rows * lanes, transcendentals=0,
            bytes_accessed=n_rows * lanes * xf.dtype.itemsize),
    )(xf)

    # ---- tiny glue: per-channel mean/var -> per-lane scale/shift ----------
    inv_n = jnp.float32(1.0 / n_samples)
    sum_c = psum.reshape(num_shards * 8, fold, C).sum(axis=(0, 1))   # (C,)
    sq_c = psq.reshape(num_shards * 8, fold, C).sum(axis=(0, 1))     # (C,)
    mean = sum_c * inv_n
    var = jnp.maximum(sq_c * inv_n - mean * mean, 0.0)               # biased
    inv_std = lax.rsqrt(var + jnp.float32(eps))
    scale = gamma.astype(jnp.float32) * inv_std
    shift = beta.astype(jnp.float32) - mean * scale
    scale_f = jnp.tile(scale, fold).reshape(1, lanes)
    shift_f = jnp.tile(shift, fold).reshape(1, lanes)

    # ---- pass 2: streaming fused multiply-add ------------------------------
    return pl.pallas_call(
        _normalize_kernel,
        out_shape=jax.ShapeDtypeStruct((n_rows, lanes), out_dtype),
        grid_spec=pltpu.PrefetchScalarGridSpec(
            num_scalar_prefetch=0,
            grid=(n_tiles,),
            in_specs=[pl.BlockSpec((row_tile, lanes), lambda i: (i, 0)),
                      pl.BlockSpec((1, lanes), lambda i: (0, 0)),
                      pl.BlockSpec((1, lanes), lambda i: (0, 0))],
            out_specs=pl.BlockSpec((row_tile, lanes), lambda i: (i, 0))),
        compiler_params=pltpu.CompilerParams(
            dimension_semantics=("parallel",),
            vmem_limit_bytes=_STREAM_VMEM_LIMIT),
        cost_estimate=pl.CostEstimate(
            flops=2 * n_rows * lanes, transcendentals=0,
            bytes_accessed=2 * n_rows * lanes * xf.dtype.itemsize),
    )(xf, scale_f, shift_f)


# --------------------------------------------------------------------------
# Fused VMEM-resident path (x read from HBM exactly once, written once)
# --------------------------------------------------------------------------
def _fused_kernel(x_hbm, gamma_ref, beta_ref, y_hbm, buf, acc_s, acc_q,
                  sem_in, sem_out, *, chunk, n_full, rem, fold, C,
                  inv_n, eps):
    lanes = buf.shape[1]
    tail_rows = buf.shape[0] - n_full * chunk     # 8-padded tail block (>= rem)

    # -- kick off every input DMA now; the stats loop overlaps with them -----
    def _issue(i, c):
        r0 = pl.multiple_of(i * chunk, 8)
        pltpu.make_async_copy(x_hbm.at[pl.ds(r0, chunk)],
                              buf.at[pl.ds(r0, chunk)], sem_in.at[i]).start()
        return c
    if n_full:
        lax.fori_loop(0, n_full, _issue, 0)
    if rem:
        r0 = n_full * chunk
        pltpu.make_async_copy(x_hbm.at[pl.ds(r0, rem)],
                              buf.at[pl.ds(r0, rem)], sem_in.at[n_full]).start()

    acc_s[...] = jnp.zeros_like(acc_s)
    acc_q[...] = jnp.zeros_like(acc_q)

    # -- pass A: per-lane sum / sum-of-squares over the resident copy --------
    def _accumulate(xb, nrows):
        x3 = xb.reshape(nrows // 8, 8, lanes)
        acc_s[...] += jnp.sum(x3, axis=0)
        acc_q[...] += jnp.sum(x3 * x3, axis=0)

    def _stats(i, c):
        pltpu.make_async_copy(x_hbm.at[pl.ds(0, chunk)],
                              buf.at[pl.ds(0, chunk)], sem_in.at[i]).wait()
        r0 = pl.multiple_of(i * chunk, 8)
        _accumulate(buf[pl.ds(r0, chunk), :].astype(jnp.float32), chunk)
        return c
    if n_full:
        lax.fori_loop(0, n_full, _stats, 0)
    if rem:
        r0 = n_full * chunk
        pltpu.make_async_copy(x_hbm.at[pl.ds(r0, rem)],
                              buf.at[pl.ds(r0, rem)], sem_in.at[n_full]).wait()
        xb = buf[pl.ds(r0, tail_rows), :].astype(jnp.float32)
        rows = lax.broadcasted_iota(jnp.int32, (tail_rows, 1), 0)
        _accumulate(jnp.where(rows < rem, xb, 0.0), tail_rows)

    # -- per-channel stats -> per-lane scale / shift --------------------------
    s = jnp.sum(acc_s[...], axis=0, keepdims=True)     # (1, lanes)
    q = jnp.sum(acc_q[...], axis=0, keepdims=True)
    if fold > 1:                                        # combine fold groups
        sc, qc = s[:, 0:C], q[:, 0:C]
        for f in range(1, fold):
            sc = sc + s[:, f * C:(f + 1) * C]
            qc = qc + q[:, f * C:(f + 1) * C]
        s = jnp.concatenate([sc] * fold, axis=1)        # broadcast back
        q = jnp.concatenate([qc] * fold, axis=1)
    mean = s * inv_n
    var = jnp.maximum(q * inv_n - mean * mean, 0.0)     # biased variance
    inv_std = lax.rsqrt(var + eps)
    scale = gamma_ref[...] * inv_std
    shift = beta_ref[...] - mean * scale

    # -- pass B: normalize in place, stream each chunk back to HBM -----------
    def _norm(i, c):
        r0 = pl.multiple_of(i * chunk, 8)
        v = buf[pl.ds(r0, chunk), :].astype(jnp.float32)
        buf[pl.ds(r0, chunk), :] = (v * scale + shift).astype(buf.dtype)
        pltpu.make_async_copy(buf.at[pl.ds(r0, chunk)],
                              y_hbm.at[pl.ds(r0, chunk)], sem_out.at[i]).start()
        return c
    if n_full:
        lax.fori_loop(0, n_full, _norm, 0)
    if rem:
        r0 = n_full * chunk
        v = buf[pl.ds(r0, tail_rows), :].astype(jnp.float32)
        buf[pl.ds(r0, tail_rows), :] = (v * scale + shift).astype(buf.dtype)
        pltpu.make_async_copy(buf.at[pl.ds(r0, rem)],
                              y_hbm.at[pl.ds(r0, rem)], sem_out.at[n_full]).start()

    # -- drain all output DMAs -------------------------------------------------
    def _drain(i, c):
        pltpu.make_async_copy(buf.at[pl.ds(0, chunk)],
                              y_hbm.at[pl.ds(0, chunk)], sem_out.at[i]).wait()
        return c
    if n_full:
        lax.fori_loop(0, n_full, _drain, 0)
    if rem:
        r0 = n_full * chunk
        pltpu.make_async_copy(buf.at[pl.ds(r0, rem)],
                              y_hbm.at[pl.ds(r0, rem)], sem_out.at[n_full]).wait()


def _fused_forward(xf, gamma, beta, *, eps, n_samples, fold, C, out_dtype,
                   chunk_rows=None):
    n_rows, lanes = xf.shape
    buf_rows = _round_up(n_rows, 8)
    if chunk_rows is None:
        chunk_rows = _FUSED_CHUNK_BYTES // (lanes * xf.dtype.itemsize)
    chunk_rows = max(8, (chunk_rows // 8) * 8)
    n_full = n_rows // chunk_rows
    rem = n_rows - n_full * chunk_rows
    n_chunks = n_full + (1 if rem else 0)

    gamma_f = jnp.tile(gamma.astype(jnp.float32), fold).reshape(1, lanes)
    beta_f = jnp.tile(beta.astype(jnp.float32), fold).reshape(1, lanes)

    buf_bytes = buf_rows * lanes * xf.dtype.itemsize
    vmem_limit = min(buf_bytes + 16 * _MIB, _vmem_capacity_bytes())

    kernel = functools.partial(
        _fused_kernel, chunk=chunk_rows, n_full=n_full, rem=rem,
        fold=fold, C=C, inv_n=1.0 / float(n_samples), eps=float(eps))

    return pl.pallas_call(
        kernel,
        out_shape=jax.ShapeDtypeStruct((n_rows, lanes), out_dtype),
        grid_spec=pltpu.PrefetchScalarGridSpec(
            num_scalar_prefetch=0,
            grid=(1,),
            in_specs=[
                pl.BlockSpec(memory_space=pl.ANY),            # x stays in HBM
                pl.BlockSpec((1, lanes), lambda i: (0, 0)),   # gamma (tiled)
                pl.BlockSpec((1, lanes), lambda i: (0, 0)),   # beta (tiled)
            ],
            out_specs=pl.BlockSpec(memory_space=pl.ANY),      # y stays in HBM
            scratch_shapes=[
                pltpu.VMEM((buf_rows, lanes), xf.dtype),      # resident copy
                pltpu.VMEM((8, lanes), jnp.float32),          # sum partials
                pltpu.VMEM((8, lanes), jnp.float32),          # sumsq partials
                pltpu.SemaphoreType.DMA((n_chunks,)),         # input DMAs
                pltpu.SemaphoreType.DMA((n_chunks,)),         # output DMAs
            ]),
        compiler_params=pltpu.CompilerParams(
            dimension_semantics=("arbitrary",),
            vmem_limit_bytes=vmem_limit),
        cost_estimate=pl.CostEstimate(
            flops=6 * n_rows * lanes, transcendentals=lanes,
            bytes_accessed=2 * n_rows * lanes * xf.dtype.itemsize),
    )(xf, gamma_f, beta_f)


# --------------------------------------------------------------------------
# Public wrapper
# --------------------------------------------------------------------------
def batchnorm1d_pallas(x, gamma, beta, *, eps=1e-5, row_tile=None,
                       use_fused=None, fused_chunk_rows=None):
    """Forward of speechbrain _BatchNorm1d (training-mode batch statistics).

    x: (batch, time, channels) or (batch, channels).  gamma/beta: (channels,).
    """
    orig_shape = x.shape
    C = orig_shape[-1]
    N = 1
    for d in orig_shape[:-1]:
        N *= d
    x2 = x.reshape(N, C)

    # Lane folding: pack `fold` consecutive samples into the lane dimension so
    # the last dim becomes a multiple of 128 (lane-dense DMAs, no vst.msk).
    fold = 1
    if C % 128 != 0:
        fold = 128 // math.gcd(C, 128)
        while fold > 1 and N % fold != 0:
            fold //= 2
    lanes = fold * C
    n_rows = N // fold
    xf = x2.reshape(n_rows, lanes)

    if use_fused is None:
        buf_bytes = _round_up(n_rows, 8) * lanes * x.dtype.itemsize
        # Keep the resident copy comfortably inside per-core VMEM (64 MiB on
        # v7x, 128 MiB on v5e/v6e) alongside chunked DMA + compiler scratch.
        use_fused = buf_bytes <= (_vmem_capacity_bytes() // 8) * 3

    if use_fused:
        yf = _fused_forward(xf, gamma, beta, eps=eps, n_samples=N, fold=fold,
                            C=C, out_dtype=x.dtype, chunk_rows=fused_chunk_rows)
    else:
        yf = _two_pass_forward(xf, gamma, beta, eps=eps, n_samples=N,
                               fold=fold, C=C, out_dtype=x.dtype,
                               row_tile=row_tile)
    return yf.reshape(orig_shape)


def batchnorm1d_ref(x, gamma, beta, eps=1e-5):
    """Pure-JAX reference matching PyTorch training-mode BatchNorm1d."""
    C = x.shape[-1]
    x2 = x.reshape(-1, C).astype(jnp.float32)
    mean = jnp.mean(x2, axis=0, keepdims=True)
    var = jnp.mean((x2 - mean) ** 2, axis=0, keepdims=True)  # biased
    y = (x2 - mean) / jnp.sqrt(var + eps) * gamma[None, :] + beta[None, :]
    return y.reshape(x.shape).astype(x.dtype)


if __name__ == "__main__":
    key = jax.random.PRNGKey(0)
    k1, k2, k3, k4, k5 = jax.random.split(key, 5)

    # 1) Primary (batch, time, channels): fused resident path, lane folding.
    batch, time, channels = 2, 8, 32
    x = jax.random.normal(k1, (batch, time, channels), dtype=jnp.float32)
    gamma = 1.0 + 0.1 * jax.random.normal(k2, (channels,), dtype=jnp.float32)
    beta = 0.1 * jax.random.normal(k3, (channels,), dtype=jnp.float32)
    y = jax.block_until_ready(batchnorm1d_pallas(x, gamma, beta, eps=1e-5))
    assert y.shape == x.shape and y.dtype == x.dtype
    assert jnp.allclose(y, batchnorm1d_ref(x, gamma, beta), atol=1e-4, rtol=1e-4)

    # 2) Fused path: multiple chunks, non-multiple-of-8 tail, fold-combine.
    xb_ = jax.random.normal(k4, (2, 30, 48), dtype=jnp.float32)
    g48 = jnp.linspace(0.9, 1.1, 48, dtype=jnp.float32)
    b48 = jnp.linspace(-0.1, 0.1, 48, dtype=jnp.float32)
    y2 = jax.block_until_ready(
        batchnorm1d_pallas(xb_, g48, b48, eps=1e-5, fused_chunk_rows=8))
    assert jnp.allclose(y2, batchnorm1d_ref(xb_, g48, b48), atol=1e-4, rtol=1e-4)

    # 3) Two-pass streaming path: sharded stats, many tiles, unmasked fast path.
    xc_ = jax.random.normal(k5, (4, 64, 32), dtype=jnp.float32)
    y3 = jax.block_until_ready(
        batchnorm1d_pallas(xc_, gamma, beta, eps=1e-5, use_fused=False,
                           row_tile=8))
    assert jnp.allclose(y3, batchnorm1d_ref(xc_, gamma, beta), atol=1e-4, rtol=1e-4)

    # 4) Two-pass with a partial last tile (masked slow path).
    y4 = jax.block_until_ready(
        batchnorm1d_pallas(xb_, g48, b48, eps=1e-5, use_fused=False,
                           row_tile=8))
    assert jnp.allclose(y4, batchnorm1d_ref(xb_, g48, b48), atol=1e-4, rtol=1e-4)

    # 5) 2-D input (batch, channels) == BatchNorm1d over the batch dim.
    x2d = jax.random.normal(k1, (16, 32), dtype=jnp.float32)
    y5 = jax.block_until_ready(batchnorm1d_pallas(x2d, gamma, beta, eps=1e-5))
    assert jnp.allclose(y5, batchnorm1d_ref(x2d, gamma, beta), atol=1e-4, rtol=1e-4)

    print("KERNEL_OK")
</pallas_src>

<mosaic_0001>
module attributes {stable_mosaic.version = 11 : i64} {
  func.func @_fused_kernel(%arg0: i32, %arg1: memref<4x128xf32, #tpu.memory_space<any>>, %arg2: memref<1x128xf32, #tpu.memory_space<vmem>>, %arg3: memref<1x128xf32, #tpu.memory_space<vmem>>, %arg4: memref<4x128xf32, #tpu.memory_space<any>>, %arg5: memref<8x128xf32, #tpu.memory_space<vmem>>, %arg6: memref<8x128xf32, #tpu.memory_space<vmem>>, %arg7: memref<8x128xf32, #tpu.memory_space<vmem>>, %arg8: memref<1x!tpu.dma_semaphore, #tpu.memory_space<semaphore_mem>>, %arg9: memref<1x!tpu.dma_semaphore, #tpu.memory_space<semaphore_mem>>) attributes {dimension_semantics = [#tpu.dimension_semantics<arbitrary>], iteration_bounds = array<i64: 1>, scalar_prefetch = 0 : i64, scratch_operands = 5 : i64, tpu.core_type = #tpu.core_type<tc>, window_params = [{}, {pipeline_mode = #tpu.pipeline_mode<synchronous>, transform_indices = @transform_1, window_bounds = array<i64: 1, 128>}, {pipeline_mode = #tpu.pipeline_mode<synchronous>, transform_indices = @transform_2, window_bounds = array<i64: 1, 128>}, {}]} {
    %c0_i32 = arith.constant 0 : i32
    %c0_i32_0 = arith.constant 0 : i32
    %c0_i32_1 = arith.constant 0 : i32
    %0 = tpu.memref_slice %arg1[%c0_i32_0, %c0_i32_1] : memref<4x128xf32, #tpu.memory_space<any>> -> memref<4x128xf32, #tpu.memory_space<any>>
    %c0_i32_2 = arith.constant 0 : i32
    %c0_i32_3 = arith.constant 0 : i32
    %1 = tpu.memref_slice %arg5[%c0_i32_2, %c0_i32_3] : memref<8x128xf32, #tpu.memory_space<vmem>> -> memref<4x128xf32, #tpu.memory_space<vmem>>
    %2 = tpu.memref_slice %arg8[%c0_i32] : memref<1x!tpu.dma_semaphore, #tpu.memory_space<semaphore_mem>> -> memref<1x!tpu.dma_semaphore, #tpu.memory_space<semaphore_mem>>
    %3 = tpu.memref_squeeze %2 : memref<1x!tpu.dma_semaphore, #tpu.memory_space<semaphore_mem>> -> memref<!tpu.dma_semaphore, #tpu.memory_space<semaphore_mem>>
    tpu.enqueue_dma source(%0 : memref<4x128xf32, #tpu.memory_space<any>>) target(%1 : memref<4x128xf32, #tpu.memory_space<vmem>>) target_semaphore(%3 : memref<!tpu.dma_semaphore, #tpu.memory_space<semaphore_mem>>)
    %cst = arith.constant 0.000000e+00 : f32
    %4 = vector.broadcast %cst : f32 to vector<8x128xf32>
    %c0 = arith.constant 0 : index
    %c0_4 = arith.constant 0 : index
    %5 = vector.load %arg6[%c0, %c0_4] : memref<8x128xf32, #tpu.memory_space<vmem>>, vector<8x128xf32>
    tpu.vector_store %arg6[%c0, %c0_4], %4 {strides = array<i32>} : memref<8x128xf32, #tpu.memory_space<vmem>>, vector<8x128xf32>,
    %cst_5 = arith.constant 0.000000e+00 : f32
    %6 = vector.broadcast %cst_5 : f32 to vector<8x128xf32>
    %c0_6 = arith.constant 0 : index
    %c0_7 = arith.constant 0 : index
    %7 = vector.load %arg7[%c0_6, %c0_7] : memref<8x128xf32, #tpu.memory_space<vmem>>, vector<8x128xf32>
    tpu.vector_store %arg7[%c0_6, %c0_7], %6 {strides = array<i32>} : memref<8x128xf32, #tpu.memory_space<vmem>>, vector<8x128xf32>,
    %c0_i32_8 = arith.constant 0 : i32
    %c0_i32_9 = arith.constant 0 : i32
    %c0_i32_10 = arith.constant 0 : i32
    %8 = tpu.memref_slice %arg1[%c0_i32_9, %c0_i32_10] : memref<4x128xf32, #tpu.memory_space<any>> -> memref<4x128xf32, #tpu.memory_space<any>>
    %c0_i32_11 = arith.constant 0 : i32
    %c0_i32_12 = arith.constant 0 : i32
    %9 = tpu.memref_slice %arg5[%c0_i32_11, %c0_i32_12] : memref<8x128xf32, #tpu.memory_space<vmem>> -> memref<4x128xf32, #tpu.memory_space<vmem>>
    %10 = tpu.memref_slice %arg8[%c0_i32_8] : memref<1x!tpu.dma_semaphore, #tpu.memory_space<semaphore_mem>> -> memref<1x!tpu.dma_semaphore, #tpu.memory_space<semaphore_mem>>
    %11 = tpu.memref_squeeze %10 : memref<1x!tpu.dma_semaphore, #tpu.memory_space<semaphore_mem>> -> memref<!tpu.dma_semaphore, #tpu.memory_space<semaphore_mem>>
    tpu.wait_dma2 semaphore(%11 : memref<!tpu.dma_semaphore, #tpu.memory_space<semaphore_mem>>) src(%8 : memref<4x128xf32, #tpu.memory_space<any>>) dst(%9 : memref<4x128xf32, #tpu.memory_space<vmem>>)
    %c0_13 = arith.constant 0 : index
    %c0_14 = arith.constant 0 : index
    %12 = vector.load %arg5[%c0_13, %c0_14] : memref<8x128xf32, #tpu.memory_space<vmem>>, vector<8x128xf32>
    %13 = tpu.iota {dimensions = array<i32: 0>} : vector<8x1xi32>
    %c4_i32 = arith.constant 4 : i32
    %14 = vector.broadcast %c4_i32 : i32 to vector<8x1xi32>
    %15 = arith.cmpi slt, %13, %14 : vector<8x1xi32>
    %cst_15 = arith.constant 0.000000e+00 : f32
    %16 = vector.shape_cast %15 : vector<8x1xi1> to vector<8x1xi1>
    %17 = vector.broadcast %16 : vector<8x1xi1> to vector<8x128xi1>
    %18 = vector.broadcast %cst_15 : f32 to vector<8x128xf32>
    %19 = arith.select %17, %12, %18 : vector<8x128xi1>, vector<8x128xf32>
    %20 = vector.shape_cast %19 : vector<8x128xf32> to vector<1x8x128xf32>
    %c0_16 = arith.constant 0 : index
    %c0_17 = arith.constant 0 : index
    %21 = vector.load %arg6[%c0_16, %c0_17] : memref<8x128xf32, #tpu.memory_space<vmem>>, vector<8x128xf32>
    %cst_18 = arith.constant dense<0.000000e+00> : vector<8x128xf32>
    %22 = vector.multi_reduction <add>, %20, %cst_18 [0] : vector<1x8x128xf32> to vector<8x128xf32>
    %23 = arith.addf %21, %22 : vector<8x128xf32>
    %c0_19 = arith.constant 0 : index
    %c0_20 = arith.constant 0 : index
    %24 = vector.load %arg6[%c0_19, %c0_20] : memref<8x128xf32, #tpu.memory_space<vmem>>, vector<8x128xf32>
    tpu.vector_store %arg6[%c0_19, %c0_20], %23 {strides = array<i32>} : memref<8x128xf32, #tpu.memory_space<vmem>>, vector<8x128xf32>,
    %c0_21 = arith.constant 0 : index
    %c0_22 = arith.constant 0 : index
    %25 = vector.load %arg7[%c0_21, %c0_22] : memref<8x128xf32, #tpu.memory_space<vmem>>, vector<8x128xf32>
    %26 = arith.mulf %20, %20 : vector<1x8x128xf32>
    %cst_23 = arith.constant dense<0.000000e+00> : vector<8x128xf32>
    %27 = vector.multi_reduction <add>, %26, %cst_23 [0] : vector<1x8x128xf32> to vector<8x128xf32>
    %28 = arith.addf %25, %27 : vector<8x128xf32>
    %c0_24 = arith.constant 0 : index
    %c0_25 = arith.constant 0 : index
    %29 = vector.load %arg7[%c0_24, %c0_25] : memref<8x128xf32, #tpu.memory_space<vmem>>, vector<8x128xf32>
    tpu.vector_store %arg7[%c0_24, %c0_25], %28 {strides = array<i32>} : memref<8x128xf32, #tpu.memory_space<vmem>>, vector<8x128xf32>,
    %c0_26 = arith.constant 0 : index
    %c0_27 = arith.constant 0 : index
    %30 = vector.load %arg6[%c0_26, %c0_27] : memref<8x128xf32, #tpu.memory_space<vmem>>, vector<8x128xf32>
    %cst_28 = arith.constant dense<0.000000e+00> : vector<128xf32>
    %31 = vector.multi_reduction <add>, %30, %cst_28 [0] : vector<8x128xf32> to vector<128xf32>
    %32 = vector.shape_cast %31 : vector<128xf32> to vector<1x128xf32>
    %c0_29 = arith.constant 0 : index
    %c0_30 = arith.constant 0 : index
    %33 = vector.load %arg7[%c0_29, %c0_30] : memref<8x128xf32, #tpu.memory_space<vmem>>, vector<8x128xf32>
    %cst_31 = arith.constant dense<0.000000e+00> : vector<128xf32>
    %34 = vector.multi_reduction <add>, %33, %cst_31 [0] : vector<8x128xf32> to vector<128xf32>
    %35 = vector.shape_cast %34 : vector<128xf32> to vector<1x128xf32>
    %36 = vector.extract_strided_slice %32 {offsets = [0, 0], sizes = [1, 32], strides = [1, 1]} : vector<1x128xf32> to vector<1x32xf32>
    %37 = vector.extract_strided_slice %35 {offsets = [0, 0], sizes = [1, 32], strides = [1, 1]} : vector<1x128xf32> to vector<1x32xf32>
    %38 = vector.extract_strided_slice %32 {offsets = [0, 32], sizes = [1, 32], strides = [1, 1]} : vector<1x128xf32> to vector<1x32xf32>
    %39 = arith.addf %36, %38 : vector<1x32xf32>
    %40 = vector.extract_strided_slice %35 {offsets = [0, 32], sizes = [1, 32], strides = [1, 1]} : vector<1x128xf32> to vector<1x32xf32>
    %41 = arith.addf %37, %40 : vector<1x32xf32>
    %42 = vector.extract_strided_slice %32 {offsets = [0, 64], sizes = [1, 32], strides = [1, 1]} : vector<1x128xf32> to vector<1x32xf32>
    %43 = arith.addf %39, %42 : vector<1x32xf32>
    %44 = vector.extract_strided_slice %35 {offsets = [0, 64], sizes = [1, 32], strides = [1, 1]} : vector<1x128xf32> to vector<1x32xf32>
    %45 = arith.addf %41, %44 : vector<1x32xf32>
    %46 = vector.extract_strided_slice %32 {offsets = [0, 96], sizes = [1, 32], strides = [1, 1]} : vector<1x128xf32> to vector<1x32xf32>
    %47 = arith.addf %43, %46 : vector<1x32xf32>
    %48 = vector.extract_strided_slice %35 {offsets = [0, 96], sizes = [1, 32], strides = [1, 1]} : vector<1x128xf32> to vector<1x32xf32>
    %49 = arith.addf %45, %48 : vector<1x32xf32>
    %50 = tpu.concatenate %47, %47, %47, %47 in 1 : vector<1x32xf32>, vector<1x32xf32>, vector<1x32xf32>, vector<1x32xf32> -> vector<1x128xf32>
    %51 = tpu.concatenate %49, %49, %49, %49 in 1 : vector<1x32xf32>, vector<1x32xf32>, vector<1x32xf32>, vector<1x32xf32> -> vector<1x128xf32>
    %cst_32 = arith.constant 6.250000e-02 : f32
    %52 = vector.broadcast %cst_32 : f32 to vector<1x128xf32>
    %53 = arith.mulf %50, %52 : vector<1x128xf32>
    %cst_33 = arith.constant 6.250000e-02 : f32
    %54 = vector.broadcast %cst_33 : f32 to vector<1x128xf32>
    %55 = arith.mulf %51, %54 : vector<1x128xf32>
    %56 = arith.mulf %53, %53 : vector<1x128xf32>
    %57 = arith.subf %55, %56 : vector<1x128xf32>
    %cst_34 = arith.constant 0.000000e+00 : f32
    %58 = vector.broadcast %cst_34 : f32 to vector<1x128xf32>
    %59 = arith.maximumf %57, %58 : vector<1x128xf32>
    %cst_35 = arith.constant 9.99999974E-6 : f32
    %60 = vector.broadcast %cst_35 : f32 to vector<1x128xf32>
    %61 = arith.addf %59, %60 : vector<1x128xf32>
    %62 = math.rsqrt %61 : vector<1x128xf32>
    %c0_36 = arith.constant 0 : index
    %c0_37 = arith.constant 0 : index
    %63 = vector.load %arg2[%c0_36, %c0_37] : memref<1x128xf32, #tpu.memory_space<vmem>>, vector<1x128xf32>
    %64 = arith.mulf %63, %62 : vector<1x128xf32>
    %c0_38 = arith.constant 0 : index
    %c0_39 = arith.constant 0 : index
    %65 = vector.load %arg3[%c0_38, %c0_39] : memref<1x128xf32, #tpu.memory_space<vmem>>, vector<1x128xf32>
    %66 = arith.mulf %53, %64 : vector<1x128xf32>
    %67 = arith.subf %65, %66 : vector<1x128xf32>
    %c0_40 = arith.constant 0 : index
    %c0_41 = arith.constant 0 : index
    %68 = vector.load %arg5[%c0_40, %c0_41] : memref<8x128xf32, #tpu.memory_space<vmem>>, vector<8x128xf32>
    %69 = vector.broadcast %64 : vector<1x128xf32> to vector<8x128xf32>
    %70 = arith.mulf %68, %69 : vector<8x128xf32>
    %71 = vector.broadcast %67 : vector<1x128xf32> to vector<8x128xf32>
    %72 = arith.addf %70, %71 : vector<8x128xf32>
    %c0_42 = arith.constant 0 : index
    %c0_43 = arith.constant 0 : index
    %73 = vector.load %arg5[%c0_42, %c0_43] : memref<8x128xf32, #tpu.memory_space<vmem>>, vector<8x128xf32>
    tpu.vector_store %arg5[%c0_42, %c0_43], %72 {strides = array<i32>} : memref<8x128xf32, #tpu.memory_space<vmem>>, vector<8x128xf32>,
    %c0_i32_44 = arith.constant 0 : i32
    %c0_i32_45 = arith.constant 0 : i32
    %c0_i32_46 = arith.constant 0 : i32
    %74 = tpu.memref_slice %arg5[%c0_i32_45, %c0_i32_46] : memref<8x128xf32, #tpu.memory_space<vmem>> -> memref<4x128xf32, #tpu.memory_space<vmem>>
    %c0_i32_47 = arith.constant 0 : i32
    %c0_i32_48 = arith.constant 0 : i32
    %75 = tpu.memref_slice %arg4[%c0_i32_47, %c0_i32_48] : memref<4x128xf32, #tpu.memory_space<any>> -> memref<4x128xf32, #tpu.memory_space<any>>
    %76 = tpu.memref_slice %arg9[%c0_i32_44] : memref<1x!tpu.dma_semaphore, #tpu.memory_space<semaphore_mem>> -> memref<1x!tpu.dma_semaphore, #tpu.memory_space<semaphore_mem>>
    %77 = tpu.memref_squeeze %76 : memref<1x!tpu.dma_semaphore, #tpu.memory_space<semaphore_mem>> -> memref<!tpu.dma_semaphore, #tpu.memory_space<semaphore_mem>>
    tpu.enqueue_dma source(%74 : memref<4x128xf32, #tpu.memory_space<vmem>>) target(%75 : memref<4x128xf32, #tpu.memory_space<any>>) target_semaphore(%77 : memref<!tpu.dma_semaphore, #tpu.memory_space<semaphore_mem>>)
    %c0_i32_49 = arith.constant 0 : i32
    %c0_i32_50 = arith.constant 0 : i32
    %c0_i32_51 = arith.constant 0 : i32
    %78 = tpu.memref_slice %arg5[%c0_i32_50, %c0_i32_51] : memref<8x128xf32, #tpu.memory_space<vmem>> -> memref<4x128xf32, #tpu.memory_space<vmem>>
    %c0_i32_52 = arith.constant 0 : i32
    %c0_i32_53 = arith.constant 0 : i32
    %79 = tpu.memref_slice %arg4[%c0_i32_52, %c0_i32_53] : memref<4x128xf32, #tpu.memory_space<any>> -> memref<4x128xf32, #tpu.memory_space<any>>
    %80 = tpu.memref_slice %arg9[%c0_i32_49] : memref<1x!tpu.dma_semaphore, #tpu.memory_space<semaphore_mem>> -> memref<1x!tpu.dma_semaphore, #tpu.memory_space<semaphore_mem>>
    %81 = tpu.memref_squeeze %80 : memref<1x!tpu.dma_semaphore, #tpu.memory_space<semaphore_mem>> -> memref<!tpu.dma_semaphore, #tpu.memory_space<semaphore_mem>>
    tpu.wait_dma2 semaphore(%81 : memref<!tpu.dma_semaphore, #tpu.memory_space<semaphore_mem>>) src(%78 : memref<4x128xf32, #tpu.memory_space<vmem>>) dst(%79 : memref<4x128xf32, #tpu.memory_space<any>>)
    return
  }
  func.func @transform_1(%arg0: i32) -> (i32, i32) {
    %c0_i32 = arith.constant 0 : i32
    %c0_i32_0 = arith.constant 0 : i32
    %c0_i32_1 = arith.constant 0 : i32
    return %c0_i32, %c0_i32_0 : i32, i32
  }
  func.func @transform_2(%arg0: i32) -> (i32, i32) {
    %c0_i32 = arith.constant 0 : i32
    %c0_i32_0 = arith.constant 0 : i32
    %c0_i32_1 = arith.constant 0 : i32
    return %c0_i32, %c0_i32_0 : i32, i32
  }
}

</mosaic_0001>

<bundles_post_ra>
// kernel: tpu_custom_call.1
= control target key start
LH: loop header
LB: loop body
LE: loop exit
PB: predicated region body
PF: predicated region fallthrough
CT: control target
= control target key end

     0   :  { %s219_s12 = smov [#allocation2]   ;;  %s286_s0 = inlined_call_operand.hbm [shape: f32[4,128], index: 0, kind: input, shape index: {}]   ;;  %s287_s1 = inlined_call_operand.vmem [shape: f32[1,128], index: 1, kind: input, shape index: {}]   ;;  %s288_s2 = inlined_call_operand.vmem [shape: f32[1,128], index: 2, kind: input, shape index: {}]   ;;  %s289_s3 = inlined_call_operand.hbm [shape: f32[4,128], index: 3, kind: output, shape index: {}]  }
   0x1   :  { %s19_s13 = sshll.u32 %s219_s12, 4  ;;  %s243_s13 = int_to_ptr.vmem [resolvable:$true] %s19_s13 }
   0x2   :  { %s183_s14 = scalar_lea.vmem %s243_s13, 64  ;;  %s187_s16 = scalar_lea.vmem %s243_s13, 128 }
   0x3   :  { %p247_p0 = scmp.ne.s32.totalorder %s243_s13, %s183_s14  ;;  %p188_p1 = scmp.lt.s32.totalorder %s243_s13, %s243_s13 }
   0x4   :  { %p189_p2 = scmp.lt.s32.totalorder %s187_s16, %s183_s14 }
   0x6   :  { %p254_p3 = por %p189_p2, %p188_p1 }
   0x8   :  { %p191_p4 = pnand %p254_p3, %p247_p0 }
   0xa   :  { %194 = shalt.err (!%p191_p4)  }
   0xb   :  { %22 = dma.hbm_to_vmem [thread:$0]  %s286_s0, 64, %s243_s13, [#allocation5] }
   0xc   :  { %215 = dma.done.wait [#allocation5], 64 }
   0xd   :  { %216 = vsyncadd [#allocation5], 4294967232  ;;  %v168_v0 = vld [vmem:[#allocation2] sm:$0xf]  ;;  %s220_s20 = smov 64   ;;  %s221_s21 = smov 96   ;;  %v127_v44 = vlaneseq }
   0xe   :  { %v45_v1 = vrot.slane %v168_v0, 4  ;;  %v40_v2 = vmul.f32 %v168_v0, %v168_v0  ;;  %s222_s0 = smov 32   ;;  %vm94_vm0 = vcmask 261120   ;;  %vm96_vm1 = vcmask 523264   ;;  %v120_v46 = vld [vmem:[%s287_s1] sm:$0x1] }
   0xf   :  { %vm98_vm2 = vcmask 785408   ;;  %v128_v45 = vshrl.u32 %v127_v44, 7  ;;  %v122_v50 = vld [vmem:[%s288_s2] sm:$0x1] }
  0x10   :  { %v46_v3 = vadd.f32 %v168_v0, %v45_v1  ;;  %v52_v4 = vrot.slane %v40_v2, 4  ;;  %v125_v53 = vld [vmem:[#allocation2] sm:$0xff] }
  0x11   :  { %v129_v47 = vsub.s32 0, %v128_v45 }
  0x12   :  { %v47_v5 = vrot.slane %v46_v3, 2  ;;  %v53_v6 = vadd.f32 %v52_v4, %v40_v2 }
  0x14   :  { %v48_v7 = vadd.f32 %v47_v5, %v46_v3  ;;  %v54_v8 = vrot.slane %v53_v6, 2 }
  0x16   :  { %v49_v9 = vrot.slane %v48_v7, 1  ;;  %v55_v10 = vadd.f32 %v54_v8, %v53_v6 }
  0x18   :  { %v50_v11 = vadd.f32 %v49_v9, %v48_v7  ;;  %v56_v12 = vrot.slane %v55_v10, 1 }
  0x1a   :  { %68 = vrot.lane.b32.xlu1 %v50_v11, %s220_s20  ;;  %59 = vrot.lane.b32.xlu0 %v50_v11, %s221_s21  ;;  %v57_v13 = vadd.f32 %v56_v12, %v55_v10 }
  0x1e   :  { %72 = vrot.lane.b32.xlu1 %v57_v13, %s220_s20  ;;  %64 = vrot.lane.b32.xlu0 %v57_v13, %s221_s21 }
  0x22   :  { %80 = vrot.lane.b32.xlu1 %v57_v13, %s222_s0  ;;  %76 = vrot.lane.b32.xlu0 %v50_v11, %s222_s0 }
  0x8c   :  { %v69_v14 = vpop.permute.xlu1 %68  ;;  %v60_v15 = vpop.permute.xlu0 %59 }
  0x8d   :  { %v62_v16 = vadd.f32 %v60_v15, %v50_v11 }
  0x8f   :  { %v71_v20 = vadd.f32 %v69_v14, %v62_v16 }
  0x90   :  { %v73_v17 = vpop.permute.xlu1 %72  ;;  %v65_v18 = vpop.permute.xlu0 %64 }
  0x91   :  { %v67_v19 = vadd.f32 %v65_v18, %v57_v13 }
  0x93   :  { %v75_v22 = vadd.f32 %v73_v17, %v67_v19 }
  0x94   :  { %v77_v21 = vpop.permute.xlu0 %76  ;;  %v81_v24 = vpop.permute.xlu1 %80 }
  0x95   :  { %v79_v23 = vadd.f32 %v77_v21, %v71_v20  ;;  %v83_v25 = vadd.f32 %v81_v24, %v75_v22 }
  0x97   :  { %88 = vrot.lane.b32.xlu1 %v79_v23, %s220_s20  ;;  %85 = vrot.lane.b32.xlu0 %v79_v23, %s222_s0 }
  0x9b   :  { %101 = vrot.lane.b32.xlu1 %v83_v25, %s222_s0  ;;  %91 = vrot.lane.b32.xlu0 %v79_v23, %s221_s21 }
  0x9f   :  { %107 = vrot.lane.b32.xlu1 %v83_v25, %s221_s21  ;;  %104 = vrot.lane.b32.xlu0 %v83_v25, %s220_s20 }
 0x109   :  { %v89_v26 = vpop.permute.xlu1 %88  ;;  %v86_v27 = vpop.permute.xlu0 %85 }
 0x10a   :  { %v95_v28 = vsel %vm94_vm0, %v79_v23, %v86_v27 }
 0x10b   :  { %v97_v30 = vsel %vm96_vm1, %v95_v28, %v89_v26 }
 0x10d   :  { %v102_v29 = vpop.permute.xlu1 %101  ;;  %v92_v31 = vpop.permute.xlu0 %91 }
 0x10e   :  { %v99_v32 = vsel %vm98_vm2, %v97_v30, %v92_v31  ;;  %v110_v34 = vsel %vm94_vm0, %v83_v25, %v102_v29 }
 0x10f   :  { %v113_v33 = vmul.f32 0.0625, %v99_v32 }
 0x111   :  { %v108_v35 = vpop.permute.xlu1 %107  ;;  %v105_v36 = vpop.permute.xlu0 %104  ;;  %v115_v39 = vmul.f32 %v113_v33, %v113_v33 }
 0x112   :  { %v111_v37 = vsel %vm96_vm1, %v110_v34, %v105_v36 }
 0x113   :  { %v112_v38 = vsel %vm98_vm2, %v111_v37, %v108_v35 }
 0x114   :  { %v114_v40 = vmul.f32 0.0625, %v112_v38 }
 0x116   :  { %v116_v41 = vsub.f32 %v114_v40, %v115_v39 }
 0x118   :  { %v117_v42 = vmax.f32 %v116_v41, 0.0 }
 0x11a   :  { %v118_v43 = vadd.f32 1e-05, %v117_v42 }
 0x11c   :  { %173 = vrsqrt.f32 %v118_v43 }
 0x129   :  { %v174_v48 = vpop.eup %173 }
 0x12a   :  { %v121_v49 = vmul.f32 %v174_v48, %v120_v46 }
 0x12c   :  { %v123_v51 = vmul.f32 %v121_v49, %v113_v33  ;;  %v130_v52 = vrot.slane %v121_v49, %v129_v47 }
 0x12e   :  { %v124_v54 = vsub.f32 %v122_v50, %v123_v51  ;;  %v132_v55 = vmul.f32 %v130_v52, %v125_v53 }
 0x130   :  { %v137_v56 = vrot.slane %v124_v54, %v129_v47 }
 0x132   :  { %v139_v57 = vadd.f32 %v137_v56, %v132_v55 }
 0x134   :  { %140 = vst [vmem:[#allocation2] sm:$0xff] %v139_v57 }
 0x135   :  { %206 = shalt.err (!%p191_p4)  }
 0x136   :  { %151 = dma.vmem_to_hbm [thread:$0]  %s243_s13, 64, %s289_s3, [#allocation6] }
 0x137   :  { %217 = dma.done.wait [#allocation6], 64 }
 0x138   :  { %218 = vsyncadd [#allocation6], 4294967232 }
 0x139   :  { %154 = vsyncmov [#allocation5] }
 0x13c   :  { %s155_s2 = vpop.sfrf %154 }
 0x13d   :  { %p166_p5 = scmp.ne.s32.totalorder %s155_s2, 0 }
 0x13f   :  { %159 = shalt.err (%p166_p5)  }
 0x140   :  { %160 = vsyncmov [#allocation6] }
 0x143   :  { %s161_s27 = vpop.sfrf %160 }
 0x144   :  { %p167_p6 = scmp.ne.s32.totalorder %s161_s27, 0 }
 0x146   :  { %165 = shalt.err (%p167_p6)  }

</bundles_post_ra>
